<compile_context>
chip_gen: v6e
topology: v6e:2x2x1
jax: 0.10.0
libtpu: 0.0.40
codegen_flags: <defaults>
</compile_context>

<pallas_src>
import jax
import jax.numpy as jnp
from jax.experimental import pallas as pl
from jax.experimental.pallas import tpu as pltpu

NEG_SLOPE = 0.01  # nn.LeakyReLU() default


def _round_up(x, m):
    return ((x + m - 1) // m) * m


def classifier_kernel(x_ref, w1_ref, b1_ref, w2_ref, b2_ref, out_ref):
    # Hidden layer: bf16 matmul on the MXU with f32 accumulation.
    x = x_ref[...]                                                   # (TB, Dp) bf16
    h = jnp.dot(x, w1_ref[...], preferred_element_type=jnp.float32)  # (TB, Dp) f32
    h = h + b1_ref[...]                                              # f32 bias add
    h = jnp.maximum(h, NEG_SLOPE * h)                                # LeakyReLU(0.01)

    # Output layer: cast activations back to bf16 for the second MXU pass.
    logits = jnp.dot(h.astype(w2_ref.dtype), w2_ref[...],
                     preferred_element_type=jnp.float32)             # (TB, Np) f32
    out_ref[...] = (logits + b2_ref[...]).astype(out_ref.dtype)


def classifier_forward(x, w1, b1, w2, b2, *, block_b=1024):
    """x: (B, latent_dim) f32; w1: (D, D); b1: (1, D); w2: (D, 19); b2: (1, 19).
    Returns logits (B, 19) f32."""
    B, D = x.shape
    n_cls = w2.shape[1]

    # Lane-dense padded sizes and an MXU/sublane-friendly batch tile.
    Dp = _round_up(max(D, 128), 128)
    Np = _round_up(max(n_cls, 128), 128)
    TB = min(block_b, _round_up(B, 8))
    Bp = _round_up(B, TB)
    nb = Bp // TB

    f32, bf16 = jnp.float32, jnp.bfloat16

    # Zero-pad (padding contributes exactly 0 to every dot product / bias add)
    # and cast the matmul operands to bf16.
    xp = jnp.zeros((Bp, Dp), bf16).at[:B, :D].set(x.astype(bf16))
    w1p = jnp.zeros((Dp, Dp), bf16).at[:D, :D].set(w1.astype(bf16))
    b1p = jnp.zeros((1, Dp), f32).at[:, :D].set(b1.astype(f32))
    w2p = jnp.zeros((Dp, Np), bf16).at[:D, :n_cls].set(w2.astype(bf16))
    b2p = jnp.zeros((1, Np), f32).at[:, :n_cls].set(b2.astype(f32))

    cost = pl.CostEstimate(
        flops=2 * Bp * Dp * Dp + 2 * Bp * Dp * Np,
        transcendentals=0,
        bytes_accessed=(xp.size * 2 + w1p.size * 2 + w2p.size * 2
                        + b1p.size * 4 + b2p.size * 4 + Bp * Np * 4),
    )

    out = pl.pallas_call(
        classifier_kernel,
        out_shape=jax.ShapeDtypeStruct((Bp, Np), f32),
        grid_spec=pltpu.PrefetchScalarGridSpec(
            num_scalar_prefetch=0,
            grid=(nb,),
            in_specs=[
                pl.BlockSpec((TB, Dp), lambda i: (i, 0)),   # x: streamed per tile
                pl.BlockSpec((Dp, Dp), lambda i: (0, 0)),   # W1: resident
                pl.BlockSpec((1, Dp), lambda i: (0, 0)),    # b1: resident
                pl.BlockSpec((Dp, Np), lambda i: (0, 0)),   # W2: resident
                pl.BlockSpec((1, Np), lambda i: (0, 0)),    # b2: resident
            ],
            out_specs=pl.BlockSpec((TB, Np), lambda i: (i, 0)),
        ),
        compiler_params=pltpu.CompilerParams(
            dimension_semantics=("parallel",)),
        cost_estimate=cost,
    )(xp, w1p, b1p, w2p, b2p)

    return out[:B, :n_cls]


def init_params(key, latent_dim, n_classes=19):
    """Deterministic init mimicking PyTorch nn.Linear (U(-1/sqrt(fan_in), +))."""
    k1, k2, k3, k4 = jax.random.split(key, 4)
    bound = 1.0 / jnp.sqrt(latent_dim)
    w1 = jax.random.uniform(k1, (latent_dim, latent_dim), jnp.float32, -bound, bound)
    b1 = jax.random.uniform(k2, (1, latent_dim), jnp.float32, -bound, bound)
    w2 = jax.random.uniform(k3, (latent_dim, n_classes), jnp.float32, -bound, bound)
    b2 = jax.random.uniform(k4, (1, n_classes), jnp.float32, -bound, bound)
    return w1, b1, w2, b2


if __name__ == "__main__":
    key = jax.random.PRNGKey(0)
    k_x, k_p = jax.random.split(key)

    batch, latent_dim = 8, 32
    x = jax.random.normal(k_x, (batch, latent_dim), jnp.float32)
    w1, b1, w2, b2 = init_params(k_p, latent_dim)

    logits = classifier_forward(x, w1, b1, w2, b2)
    logits = jax.block_until_ready(logits)
    assert logits.shape == (batch, 19)
    assert logits.dtype == jnp.float32

    # Reference 1: same bf16-matmul / f32-accumulate recipe in pure JAX (tight).
    h_ref = jnp.dot(x.astype(jnp.bfloat16), w1.astype(jnp.bfloat16),
                    preferred_element_type=jnp.float32) + b1
    h_ref = jnp.maximum(h_ref, NEG_SLOPE * h_ref)
    ref_bf16 = jnp.dot(h_ref.astype(jnp.bfloat16), w2.astype(jnp.bfloat16),
                       preferred_element_type=jnp.float32) + b2
    assert jnp.allclose(logits, ref_bf16, atol=1e-4, rtol=1e-4)

    # Reference 2: full-f32 PyTorch semantics (loose tolerance for bf16 matmuls).
    h32 = x @ w1 + b1
    h32 = jnp.where(h32 > 0, h32, NEG_SLOPE * h32)
    ref_f32 = h32 @ w2 + b2
    assert jnp.allclose(logits, ref_f32, atol=5e-2, rtol=5e-2)

    print("KERNEL_OK")
</pallas_src>

<mosaic_0001>
module attributes {stable_mosaic.version = 11 : i64} {
  func.func @classifier_kernel(%arg0: i32, %arg1: memref<8x128xbf16, #tpu.memory_space<vmem>>, %arg2: memref<128x128xbf16, #tpu.memory_space<vmem>>, %arg3: memref<1x128xf32, #tpu.memory_space<vmem>>, %arg4: memref<128x128xbf16, #tpu.memory_space<vmem>>, %arg5: memref<1x128xf32, #tpu.memory_space<vmem>>, %arg6: memref<8x128xf32, #tpu.memory_space<vmem>>) attributes {dimension_semantics = [#tpu.dimension_semantics<parallel>], iteration_bounds = array<i64: 1>, scalar_prefetch = 0 : i64, scratch_operands = 0 : i64, tpu.core_type = #tpu.core_type<tc>, window_params = [{transform_indices = @transform_0, window_bounds = array<i64: 8, 128>}, {pipeline_mode = #tpu.pipeline_mode<synchronous>, transform_indices = @transform_1, window_bounds = array<i64: 128, 128>}, {pipeline_mode = #tpu.pipeline_mode<synchronous>, transform_indices = @transform_2, window_bounds = array<i64: 1, 128>}, {pipeline_mode = #tpu.pipeline_mode<synchronous>, transform_indices = @transform_3, window_bounds = array<i64: 128, 128>}, {pipeline_mode = #tpu.pipeline_mode<synchronous>, transform_indices = @transform_4, window_bounds = array<i64: 1, 128>}, {transform_indices = @transform_5, window_bounds = array<i64: 8, 128>}]} {
    %c0 = arith.constant 0 : index
    %c0_0 = arith.constant 0 : index
    %0 = vector.load %arg1[%c0, %c0_0] : memref<8x128xbf16, #tpu.memory_space<vmem>>, vector<8x128xbf16>
    %c0_1 = arith.constant 0 : index
    %c0_2 = arith.constant 0 : index
    %1 = vector.load %arg2[%c0_1, %c0_2] : memref<128x128xbf16, #tpu.memory_space<vmem>>, vector<128x128xbf16>
    %cst = arith.constant dense<0.000000e+00> : vector<8x128xf32>
    %2 = tpu.matmul %0, %1, %cst {dimension_numbers = #tpu.dot_dimension_numbers<[1], [0], [0], [1], [0, 0, 1, 1], [], []>} : vector<8x128xbf16>, vector<128x128xbf16>, vector<8x128xf32> -> vector<8x128xf32>
    %c0_3 = arith.constant 0 : index
    %c0_4 = arith.constant 0 : index
    %3 = vector.load %arg3[%c0_3, %c0_4] : memref<1x128xf32, #tpu.memory_space<vmem>>, vector<1x128xf32>
    %4 = vector.broadcast %3 : vector<1x128xf32> to vector<8x128xf32>
    %5 = arith.addf %2, %4 : vector<8x128xf32>
    %cst_5 = arith.constant 0.00999999977 : f32
    %6 = vector.broadcast %cst_5 : f32 to vector<8x128xf32>
    %7 = arith.mulf %6, %5 : vector<8x128xf32>
    %8 = arith.maximumf %5, %7 : vector<8x128xf32>
    %9 = arith.truncf %8 : vector<8x128xf32> to vector<8x128xbf16>
    %c0_6 = arith.constant 0 : index
    %c0_7 = arith.constant 0 : index
    %10 = vector.load %arg4[%c0_6, %c0_7] : memref<128x128xbf16, #tpu.memory_space<vmem>>, vector<128x128xbf16>
    %cst_8 = arith.constant dense<0.000000e+00> : vector<8x128xf32>
    %11 = tpu.matmul %9, %10, %cst_8 {dimension_numbers = #tpu.dot_dimension_numbers<[1], [0], [0], [1], [0, 0, 1, 1], [], []>} : vector<8x128xbf16>, vector<128x128xbf16>, vector<8x128xf32> -> vector<8x128xf32>
    %c0_9 = arith.constant 0 : index
    %c0_10 = arith.constant 0 : index
    %12 = vector.load %arg5[%c0_9, %c0_10] : memref<1x128xf32, #tpu.memory_space<vmem>>, vector<1x128xf32>
    %13 = vector.broadcast %12 : vector<1x128xf32> to vector<8x128xf32>
    %14 = arith.addf %11, %13 : vector<8x128xf32>
    %c0_11 = arith.constant 0 : index
    %c0_12 = arith.constant 0 : index
    %15 = vector.load %arg6[%c0_11, %c0_12] : memref<8x128xf32, #tpu.memory_space<vmem>>, vector<8x128xf32>
    tpu.vector_store %arg6[%c0_11, %c0_12], %14 {strides = array<i32>} : memref<8x128xf32, #tpu.memory_space<vmem>>, vector<8x128xf32>,
    return
  }
  func.func @transform_0(%arg0: i32) -> (i32, i32) {
    %c0_i32 = arith.constant 0 : i32
    %c0_i32_0 = arith.constant 0 : i32
    return %arg0, %c0_i32 : i32, i32
  }
  func.func @transform_1(%arg0: i32) -> (i32, i32) {
    %c0_i32 = arith.constant 0 : i32
    %c0_i32_0 = arith.constant 0 : i32
    %c0_i32_1 = arith.constant 0 : i32
    return %c0_i32, %c0_i32_0 : i32, i32
  }
  func.func @transform_2(%arg0: i32) -> (i32, i32) {
    %c0_i32 = arith.constant 0 : i32
    %c0_i32_0 = arith.constant 0 : i32
    %c0_i32_1 = arith.constant 0 : i32
    return %c0_i32, %c0_i32_0 : i32, i32
  }
  func.func @transform_3(%arg0: i32) -> (i32, i32) {
    %c0_i32 = arith.constant 0 : i32
    %c0_i32_0 = arith.constant 0 : i32
    %c0_i32_1 = arith.constant 0 : i32
    return %c0_i32, %c0_i32_0 : i32, i32
  }
  func.func @transform_4(%arg0: i32) -> (i32, i32) {
    %c0_i32 = arith.constant 0 : i32
    %c0_i32_0 = arith.constant 0 : i32
    %c0_i32_1 = arith.constant 0 : i32
    return %c0_i32, %c0_i32_0 : i32, i32
  }
  func.func @transform_5(%arg0: i32) -> (i32, i32) {
    %c0_i32 = arith.constant 0 : i32
    %c0_i32_0 = arith.constant 0 : i32
    return %arg0, %c0_i32 : i32, i32
  }
}

</mosaic_0001>

<bundles_post_ra>
// kernel: tpu_custom_call.1
= control target key start
LH: loop header
LB: loop body
LE: loop exit
PB: predicated region body
PF: predicated region fallthrough
CT: control target
= control target key end

     0   :  { %10 = vsyncpa [#allocation3], 0  ;;  %s546_s0 = inlined_call_operand.hbm [shape: bf16[8,128], index: 0, kind: input, shape index: {}]   ;;  %s547_s1 = inlined_call_operand.hbm [shape: bf16[128,128], index: 1, kind: input, shape index: {}]   ;;  %s548_s2 = inlined_call_operand.vmem [shape: f32[1,128], index: 2, kind: input, shape index: {}]   ;;  %s549_s3 = inlined_call_operand.hbm [shape: bf16[128,128], index: 3, kind: input, shape index: {}]   ;;  %s550_s4 = inlined_call_operand.vmem [shape: f32[1,128], index: 4, kind: input, shape index: {}]   ;;  %s551_s5 = inlined_call_operand.hbm [shape: f32[8,128], index: 5, kind: output, shape index: {}]  }
   0x1   :  { %11 = vsyncpa [#allocation6], 0 }
   0x2   :  { %12 = vsyncpa [#allocation4], 0  ;;  %s490_s18 = smov [#allocation5]  }
   0x3   :  { %s28_s19 = sshll.u32 %s490_s18, 4  ;;  %s29_s19 = int_to_ptr.vmem [resolvable:$true] %s28_s19 }
   0x4   :  { %s412_s20 = scalar_lea.vmem %s29_s19, 1024  ;;  %p417_p1 = scmp.lt.s32.totalorder %s29_s19, %s29_s19 }
   0x5   :  { %p413_p0 = scmp.ne.s32.totalorder %s29_s19, %s412_s20  ;;  %p418_p2 = scmp.lt.s32.totalorder %s412_s20, %s412_s20 }
   0x7   :  { %p419_p3 = por %p418_p2, %p417_p1 }
   0x9   :  { %p420_p4 = pnand %p419_p3, %p413_p0 }
   0xb   :  { %423 = shalt.err (!%p420_p4)
}
   0xc   :  { %s491_s21 = smov 64   ;;  %s492_s22 = smov 4  }
   0xd   :  { %34 = dma.hbm_to_vmem [thread:$0]  %s547_s1, 1024, %s29_s19, [#allocation6], %s491_s21, %s491_s21, %s492_s22  }
   0xe   :  { %s493_s25 = smov [#allocation2]   ;;  %s494_s27 = smov [#allocation7]  }
   0xf   :  { %s19_s26 = sshll.u32 %s493_s25, 4  ;;  %s42_s28 = sshll.u32 %s494_s27, 4  ;;  %s20_s26 = int_to_ptr.vmem [resolvable:$true] %s19_s26  ;;  %s43_s28 = int_to_ptr.vmem [resolvable:$true] %s42_s28 }
  0x10   :  { %s432_s29 = scalar_lea.vmem %s20_s26, 64  ;;  %p437_p6 = scmp.lt.s32.totalorder %s20_s26, %s20_s26 }
  0x11   :  { %p433_p5 = scmp.ne.s32.totalorder %s20_s26, %s432_s29  ;;  %p438_p7 = scmp.lt.s32.totalorder %s432_s29, %s432_s29 }
  0x13   :  { %p439_p8 = por %p438_p7, %p437_p6 }
  0x15   :  { %p440_p9 = pnand %p439_p8, %p433_p5 }
  0x17   :  { %443 = shalt.err (!%p440_p9)
}
  0x18   :  { %22 = dma.hbm_to_vmem [thread:$0]  %s546_s0, 64, %s20_s26, [#allocation3]  }
  0x19   :  { %s452_s7 = scalar_lea.vmem %s43_s28, 1024  ;;  %p457_p11 = scmp.lt.s32.totalorder %s43_s28, %s43_s28 }
  0x1a   :  { %p453_p10 = scmp.ne.s32.totalorder %s43_s28, %s452_s7  ;;  %p458_p12 = scmp.lt.s32.totalorder %s452_s7, %s452_s7 }
  0x1c   :  { %p459_p13 = por %p458_p12, %p457_p11 }
  0x1e   :  { %p460_p0 = pnand %p459_p13, %p453_p10 }
  0x20   :  { %463 = shalt.err (!%p460_p0)
}
  0x21   :  { %48 = dma.hbm_to_vmem [thread:$0]  %s549_s3, 1024, %s43_s28, [#allocation6], %s491_s21, %s491_s21, %s492_s22  }
  0x22   :  { %484 = dma.done.wait [#allocation3], 64  }
  0x23   :  { %485 = vsyncadd [#allocation3], 4294967232 }
  0x24   :  { %486 = dma.done.wait [#allocation6], 2048  }
  0x25   :  { %487 = vsyncadd [#allocation6], 4294965248  ;;  %v495_v0 = vmov 0.0   ;;  %vm496_vm0 = vmmov 0   ;;  %v388_v1 = vld [vmem:[#allocation5 + $0x38] sm:$0xff]   ;;  %v389_v2 = vld [vmem:[#allocation5 + $0x30] sm:$0xff]  }
  0x26   :  { %340 = vmatprep.subr.bf16.mxu0 %v495_v0  ;;  %356 = vmatprep.mubr.msk.bf16.mxu0 %vm496_vm0, %v495_v0  ;;  %v390_v3 = vld [vmem:[#allocation5 + $0x28] sm:$0xff]   ;;  %v396_v4 = vld [vmem:[#allocation7 + $0x38] sm:$0xff]   ;;  %v391_v5 = vld [vmem:[#allocation5 + $0x20] sm:$0xff]   ;;  %s497_s11 = smov [#allocation8]  }
  0x27   :  { %360 = vmatprep.subr.bf16.mxu1 %v495_v0  ;;  %376 = vmatprep.mubr.msk.bf16.mxu1 %vm496_vm0, %v495_v0  ;;  %v397_v6 = vld [vmem:[#allocation7 + $0x30] sm:$0xff]   ;;  %v392_v7 = vld [vmem:[#allocation5 + $0x18] sm:$0xff]   ;;  %v398_v8 = vld [vmem:[#allocation7 + $0x28] sm:$0xff]   ;;  %s294_s12 = sshll.u32 %s497_s11, 4  ;;  %s295_s12 = int_to_ptr.vmem [resolvable:$true] %s294_s12 }
  0x28   :  { %341 = vmatpush3.bf16.msra.mxu0 %v388_v1  ;;  %361 = vmatpush3.bf16.msra.mxu1 %v396_v4  ;;  %v393_v9 = vld [vmem:[#allocation5 + $0x10] sm:$0xff]   ;;  %v399_v10 = vld [vmem:[#allocation7 + $0x20] sm:$0xff]   ;;  %v394_v11 = vld [vmem:[#allocation5 + $0x8] sm:$0xff]   ;;  %p469_p2 = scmp.lt.s32.totalorder %s295_s12, %s295_s12 }
  0x29   :  { %342 = vmatprep.subr.bf16.mxu0 %v495_v0  ;;  %362 = vmatprep.subr.bf16.mxu1 %v495_v0  ;;  %v400_v12 = vld [vmem:[#allocation7 + $0x18] sm:$0xff]   ;;  %v395_v13 = vld [vmem:[#allocation5] sm:$0xff]   ;;  %v401_v14 = vld [vmem:[#allocation7 + $0x10] sm:$0xff]  }
  0x2a   :  { %v61_v15 = vld [vmem:[#allocation2] sm:$0xf]  ;;  %v402_v16 = vld [vmem:[#allocation7 + $0x8] sm:$0xff]   ;;  %v403_v17 = vld [vmem:[#allocation7] sm:$0xff]  }
  0x2b   :  { %v304_v18 = vld [vmem:[%s548_s2] ss:$0 sm:$0xff]  ;;  %s464_s2 = scalar_lea.vmem %s295_s12, 128 }
  0x2c   :  { %343 = vmatpush3.bf16.msra.mxu0 %v389_v2  ;;  %363 = vmatpush3.bf16.msra.mxu1 %v397_v6  ;;  %v313_v27 = vld [vmem:[%s550_s4] ss:$0 sm:$0xff]  ;;  %p465_p1 = scmp.ne.s32.totalorder %s295_s12, %s464_s2  ;;  %p470_p3 = scmp.lt.s32.totalorder %s464_s2, %s464_s2 }
  0x2d   :  { %344 = vmatprep.subr.bf16.mxu0 %v495_v0  ;;  %364 = vmatprep.subr.bf16.mxu1 %v495_v0 }
  0x2e   :  { %p471_p4 = por %p470_p3, %p469_p2 }
  0x30   :  { %345 = vmatpush3.bf16.msra.mxu0 %v390_v3  ;;  %365 = vmatpush3.bf16.msra.mxu1 %v398_v8  ;;  %p472_p5 = pnand %p471_p4, %p465_p1 }
  0x31   :  { %346 = vmatprep.subr.bf16.mxu0 %v495_v0  ;;  %366 = vmatprep.subr.bf16.mxu1 %v495_v0 }
  0x34   :  { %347 = vmatpush3.bf16.msra.mxu0 %v391_v5  ;;  %367 = vmatpush3.bf16.msra.mxu1 %v399_v10 }
  0x35   :  { %348 = vmatprep.subr.bf16.mxu0 %v495_v0  ;;  %368 = vmatprep.subr.bf16.mxu1 %v495_v0 }
  0x38   :  { %349 = vmatpush3.bf16.msra.mxu0 %v392_v7  ;;  %369 = vmatpush3.bf16.msra.mxu1 %v400_v12 }
  0x39   :  { %350 = vmatprep.subr.bf16.mxu0 %v495_v0  ;;  %370 = vmatprep.subr.bf16.mxu1 %v495_v0 }
  0x3c   :  { %351 = vmatpush3.bf16.msra.mxu0 %v393_v9  ;;  %371 = vmatpush3.bf16.msra.mxu1 %v401_v14 }
  0x3d   :  { %352 = vmatprep.subr.bf16.mxu0 %v495_v0  ;;  %372 = vmatprep.subr.bf16.mxu1 %v495_v0 }
  0x40   :  { %353 = vmatpush3.bf16.msra.mxu0 %v394_v11  ;;  %373 = vmatpush3.bf16.msra.mxu1 %v402_v16 }
  0x41   :  { %354 = vmatprep.subr.bf16.mxu0 %v495_v0  ;;  %374 = vmatprep.subr.bf16.mxu1 %v495_v0 }
  0x44   :  { %355 = vmatpush3.bf16.msra.mxu0 %v395_v13  ;;  %375 = vmatpush3.bf16.msra.mxu1 %v403_v17 }
  0x47   :  { %357 = vmatmul.mubr.bf16.vlgmr.msra.gmra.mxu0 %v61_v15 }
 0x107   :  { %v167_v19 = vpop.f32.mrf.mxu0 }
 0x108   :  { %v168_v20 = vadd.f32 %v304_v18, %v167_v19 }
 0x109   :  { %v358_v21 = vpop.f32.mrf.mxu0 }
 0x10a   :  { %v173_v22 = vmul.f32 0.01, %v168_v20 }
 0x10b   :  { %v170_v23 = vpop.f32.mrf.mxu0 }
 0x10c   :  { %v174_v24 = vmax.f32 %v168_v20, %v173_v22 }
 0x10d   :  { %v359_v25 = vpop.f32.mrf.mxu0 }
 0x10e   :  { %v175_v26 = vpack.c.bf16 %v174_v24, %v174_v24 }
 0x110   :  { %377 = vmatmul.mubr.bf16.vlgmr.msra.gmra.mxu1 %v175_v26 }
 0x1d0   :  { %v281_v28 = vpop.f32.mrf.mxu1 }
 0x1d1   :  { %v282_v29 = vadd.f32 %v313_v27, %v281_v28 }
 0x1d2   :  { %v378_v30 = vpop.f32.mrf.mxu1 }
 0x1d3   :  { %287 = vst [vmem:[#allocation8] sm:$0xff] %v282_v29 }
 0x1d4   :  { %v284_v31 = vpop.f32.mrf.mxu1 }
 0x1d5   :  { %475 = shalt.err (!%p472_p5)
}
 0x1d6   :  { %297 = dma.vmem_to_hbm [thread:$0]  %s295_s12, 128, %s551_s5, [#allocation4]   ;;  %v379_v32 = vpop.f32.mrf.mxu1 }
 0x1d7   :  { %488 = dma.done.wait [#allocation4], 128  }
 0x1d8   :  { %489 = vsyncadd [#allocation4], 4294967168 }
 0x1d9   :  { %301 = vsyncpa [#allocation3], 1 }
 0x1da   :  { %302 = vsyncpa [#allocation6], 1 }
 0x1db   :  { %303 = vsyncpa [#allocation4], 1 }

</bundles_post_ra>
